<compile_context>
chip_gen: v5e
topology: v5e:2x2
jax: 0.10.0
libtpu: 0.0.40
codegen_flags: <defaults>
</compile_context>

<pallas_src>
import functools

import jax
import jax.numpy as jnp
from jax import lax
from jax.experimental import pallas as pl
from jax.experimental.pallas import tpu as pltpu

EPS = 1e-5
_LANE = 128
_SUBLANE = 8


def _round_up(n, m):
    return ((n + m - 1) // m) * m


def _pad2d(a, rows, cols):
    r, c = a.shape
    return jnp.pad(a, ((0, rows - r), (0, cols - c)))


def _generator_kernel(x_ref, w1_ref, bn1_ref, w2_ref, bn2_ref, w3_ref, b3_ref,
                      o_ref, *, inv_b, b_real):
    x = x_ref[...]                      # (Bp, INp) bf16
    bp = x.shape[0]

    # Row mask excludes zero-padded batch rows from the BN statistics.
    if bp != b_real:
        row = lax.broadcasted_iota(jnp.int32, (bp, 1), 0)
        mask = (row < b_real).astype(jnp.float32)
    else:
        mask = None

    def bn_relu(h, bn):
        # Exact f32 cross-sublane (XLU) reductions for batch stats: a different
        # VLIW slot than the MXU/VPU, no bf16 demotion (critical on v5e).
        gamma = bn[0:1, :]              # (1, F)
        beta = bn[1:2, :]               # (1, F)
        hm = h if mask is None else h * mask
        s = jnp.sum(hm, axis=0, keepdims=True)          # (1, F)
        ss = jnp.sum(hm * h, axis=0, keepdims=True)     # (1, F)
        mu = s * inv_b
        var = jnp.maximum(ss * inv_b - mu * mu, 0.0)    # biased variance
        scale = gamma * lax.rsqrt(var + EPS)            # fold BN affine
        shift = beta - mu * scale
        return jnp.maximum(h * scale + shift, 0.0)      # one mul+add + ReLU

    # ---- Linear 1 (bf16 MXU, f32 acc) + BN + ReLU.  Pre-BN bias dropped: it
    # cancels exactly inside BatchNorm's (h - mu).
    h = jnp.dot(x, w1_ref[...], preferred_element_type=jnp.float32)
    h = bn_relu(h, bn1_ref[...])

    # ---- Linear 2 + BN + ReLU (pre-BN bias likewise dropped) ----
    h = jnp.dot(h.astype(w2_ref.dtype), w2_ref[...],
                preferred_element_type=jnp.float32)
    h = bn_relu(h, bn2_ref[...])

    # ---- Linear 3 + Sigmoid via a single EUP tanh (exact [0,1] range) ----
    z = jnp.dot(h.astype(w3_ref.dtype), w3_ref[...],
                preferred_element_type=jnp.float32) + b3_ref[...]
    o_ref[...] = (0.5 * (jnp.tanh(0.5 * z) + 1.0)).astype(o_ref.dtype)


def prepare_params(params):
    """One-time pad + bf16-cast of the call-invariant parameters (hoisted)."""
    in_size, hidden = params["w1"].shape
    hidden2 = params["w2"].shape[1]
    out_size = params["w3"].shape[1]
    INp = _round_up(in_size, _LANE)
    Hp = _round_up(hidden, _LANE)
    H2p = _round_up(hidden2, _LANE)
    OUTp = _round_up(out_size, _LANE)

    def pack_bn(gamma, beta, cols):
        # (2, cols): row 0 = gamma, row 1 = beta.  Padded gamma = 0 keeps the
        # padded feature columns exactly zero through BN + ReLU.
        return jnp.concatenate(
            [_pad2d(gamma, 1, cols), _pad2d(beta, 1, cols)], axis=0)

    return dict(
        w1=_pad2d(params["w1"], INp, Hp).astype(jnp.bfloat16),
        bn1=pack_bn(params["g1"], params["be1"], Hp),
        w2=_pad2d(params["w2"], Hp, H2p).astype(jnp.bfloat16),
        bn2=pack_bn(params["g2"], params["be2"], H2p),
        w3=_pad2d(params["w3"], H2p, OUTp).astype(jnp.bfloat16),
        b3=_pad2d(params["b3"], 1, OUTp),
    )


@functools.partial(jax.jit, static_argnames=("out_size",))
def generator_forward(noise, prepped, *, out_size):
    """noise: (B, input_size) f32; prepped: output of prepare_params()."""
    B, _ = noise.shape
    INp = prepped["w1"].shape[0]
    OUTp = prepped["w3"].shape[1]
    Bp = _round_up(B, _SUBLANE)

    x_p = _pad2d(noise, Bp, INp).astype(jnp.bfloat16)

    kernel = functools.partial(_generator_kernel, inv_b=1.0 / B, b_real=B)
    vmem = pl.BlockSpec(memory_space=pltpu.MemorySpace.VMEM)
    args = (x_p, prepped["w1"], prepped["bn1"], prepped["w2"], prepped["bn2"],
            prepped["w3"], prepped["b3"])

    # TODO(synk): for a loop over many minibatches, add a leading "parallel"
    # grid axis (weights' index_maps return a constant block -> VMEM-resident)
    # so v7x's second TensorCore is used, and add B-tiling with two-pass BN
    # stats before the whole-batch-resident layout hits v7x's 64 MiB VMEM.
    out_p = pl.pallas_call(
        kernel,
        out_shape=jax.ShapeDtypeStruct((Bp, OUTp), jnp.bfloat16),
        in_specs=[vmem] * len(args),
        out_specs=vmem,
    )(*args)

    # Padded rows/cols of out_p are garbage (BN shift / sigmoid(0)); always
    # slice before exposing.
    return out_p[:B, :out_size]


def init_params(key, input_size, output_size, hidden_size):
    """Deterministic synthetic parameters (PyTorch-like init, (in,out) weights)."""
    ks = jax.random.split(key, 3)

    def lin(k, fan_in, fan_out):
        kw, kb = jax.random.split(k)
        bound = 1.0 / jnp.sqrt(fan_in)
        w = jax.random.uniform(kw, (fan_in, fan_out), jnp.float32, -bound, bound)
        b = jax.random.uniform(kb, (1, fan_out), jnp.float32, -bound, bound)
        return w, b

    w1, b1 = lin(ks[0], input_size, hidden_size)
    w2, b2 = lin(ks[1], hidden_size, 2 * hidden_size)
    w3, b3 = lin(ks[2], 2 * hidden_size, output_size)
    # BatchNorm1d affine params: PyTorch init -> gamma=1, beta=0
    g1 = jnp.ones((1, hidden_size), jnp.float32)
    be1 = jnp.zeros((1, hidden_size), jnp.float32)
    g2 = jnp.ones((1, 2 * hidden_size), jnp.float32)
    be2 = jnp.zeros((1, 2 * hidden_size), jnp.float32)
    return dict(w1=w1, b1=b1, g1=g1, be1=be1,
                w2=w2, b2=b2, g2=g2, be2=be2,
                w3=w3, b3=b3)


def reference_forward(noise, p):
    """Pure-JAX f32 reference of the same forward (training-mode batchnorm)."""
    h = noise @ p["w1"] + p["b1"]
    mu = h.mean(0, keepdims=True); var = ((h - mu) ** 2).mean(0, keepdims=True)
    h = jnp.maximum((h - mu) / jnp.sqrt(var + EPS) * p["g1"] + p["be1"], 0.0)
    h = h @ p["w2"] + p["b2"]
    mu = h.mean(0, keepdims=True); var = ((h - mu) ** 2).mean(0, keepdims=True)
    h = jnp.maximum((h - mu) / jnp.sqrt(var + EPS) * p["g2"] + p["be2"], 0.0)
    z = h @ p["w3"] + p["b3"]
    return jax.nn.sigmoid(z)


if __name__ == "__main__":
    # Small shapes consistent with the module: batch=8, input=16, hidden=32, output=24
    B, INPUT, HIDDEN, OUTPUT = 8, 16, 32, 24

    key = jax.random.PRNGKey(0)
    k_noise, k_params = jax.random.split(key)
    noise = jax.random.normal(k_noise, (B, INPUT), jnp.float32)
    params = init_params(k_params, INPUT, OUTPUT, HIDDEN)
    prepped = prepare_params(params)   # one-time pad/cast, reused across calls

    out = jax.block_until_ready(
        generator_forward(noise, prepped, out_size=OUTPUT))
    ref = reference_forward(noise, params)

    assert out.shape == (B, OUTPUT)
    out_f32 = out.astype(jnp.float32)
    # bf16 matmul operands + bf16 output -> compare to f32 ref with loose atol.
    max_diff = jnp.max(jnp.abs(out_f32 - ref))
    assert jnp.allclose(out_f32, ref, atol=3e-2), \
        f"mismatch vs JAX reference: {max_diff}"
    assert bool(jnp.all((out_f32 >= 0.0) & (out_f32 <= 1.0)))

    print("KERNEL_OK")
</pallas_src>

<mosaic_0001>
module attributes {stable_mosaic.version = 11 : i64} {
  func.func @_generator_kernel(%arg0: memref<8x128xbf16, #tpu.memory_space<vmem>>, %arg1: memref<128x128xbf16, #tpu.memory_space<vmem>>, %arg2: memref<2x128xf32, #tpu.memory_space<vmem>>, %arg3: memref<128x128xbf16, #tpu.memory_space<vmem>>, %arg4: memref<2x128xf32, #tpu.memory_space<vmem>>, %arg5: memref<128x128xbf16, #tpu.memory_space<vmem>>, %arg6: memref<1x128xf32, #tpu.memory_space<vmem>>, %arg7: memref<8x128xbf16, #tpu.memory_space<vmem>>) attributes {dimension_semantics = [], scalar_prefetch = 0 : i64, scratch_operands = 0 : i64, tpu.core_type = #tpu.core_type<tc>} {
    %c0 = arith.constant 0 : index
    %c0_0 = arith.constant 0 : index
    %0 = vector.load %arg0[%c0, %c0_0] : memref<8x128xbf16, #tpu.memory_space<vmem>>, vector<8x128xbf16>
    %c0_1 = arith.constant 0 : index
    %c0_2 = arith.constant 0 : index
    %1 = vector.load %arg1[%c0_1, %c0_2] : memref<128x128xbf16, #tpu.memory_space<vmem>>, vector<128x128xbf16>
    %cst = arith.constant dense<0.000000e+00> : vector<8x128xf32>
    %2 = tpu.matmul %0, %1, %cst {dimension_numbers = #tpu.dot_dimension_numbers<[1], [0], [0], [1], [0, 0, 1, 1], [], []>} : vector<8x128xbf16>, vector<128x128xbf16>, vector<8x128xf32> -> vector<8x128xf32>
    %c0_3 = arith.constant 0 : index
    %c0_4 = arith.constant 0 : index
    %3 = vector.load %arg2[%c0_3, %c0_4] : memref<2x128xf32, #tpu.memory_space<vmem>>, vector<2x128xf32>
    %4 = vector.extract_strided_slice %3 {offsets = [0, 0], sizes = [1, 128], strides = [1, 1]} : vector<2x128xf32> to vector<1x128xf32>
    %5 = vector.extract_strided_slice %3 {offsets = [1, 0], sizes = [1, 128], strides = [1, 1]} : vector<2x128xf32> to vector<1x128xf32>
    %cst_5 = arith.constant dense<0.000000e+00> : vector<128xf32>
    %6 = vector.multi_reduction <add>, %2, %cst_5 [0] : vector<8x128xf32> to vector<128xf32>
    %7 = vector.shape_cast %6 : vector<128xf32> to vector<1x128xf32>
    %8 = arith.mulf %2, %2 : vector<8x128xf32>
    %cst_6 = arith.constant dense<0.000000e+00> : vector<128xf32>
    %9 = vector.multi_reduction <add>, %8, %cst_6 [0] : vector<8x128xf32> to vector<128xf32>
    %10 = vector.shape_cast %9 : vector<128xf32> to vector<1x128xf32>
    %cst_7 = arith.constant 1.250000e-01 : f32
    %11 = vector.broadcast %cst_7 : f32 to vector<1x128xf32>
    %12 = arith.mulf %7, %11 : vector<1x128xf32>
    %cst_8 = arith.constant 1.250000e-01 : f32
    %13 = vector.broadcast %cst_8 : f32 to vector<1x128xf32>
    %14 = arith.mulf %10, %13 : vector<1x128xf32>
    %15 = arith.mulf %12, %12 : vector<1x128xf32>
    %16 = arith.subf %14, %15 : vector<1x128xf32>
    %cst_9 = arith.constant 0.000000e+00 : f32
    %17 = vector.broadcast %cst_9 : f32 to vector<1x128xf32>
    %18 = arith.maximumf %16, %17 : vector<1x128xf32>
    %cst_10 = arith.constant 9.99999974E-6 : f32
    %19 = vector.broadcast %cst_10 : f32 to vector<1x128xf32>
    %20 = arith.addf %18, %19 : vector<1x128xf32>
    %21 = math.rsqrt %20 : vector<1x128xf32>
    %22 = arith.mulf %4, %21 : vector<1x128xf32>
    %23 = arith.mulf %12, %22 : vector<1x128xf32>
    %24 = arith.subf %5, %23 : vector<1x128xf32>
    %25 = vector.broadcast %22 : vector<1x128xf32> to vector<8x128xf32>
    %26 = arith.mulf %2, %25 : vector<8x128xf32>
    %27 = vector.broadcast %24 : vector<1x128xf32> to vector<8x128xf32>
    %28 = arith.addf %26, %27 : vector<8x128xf32>
    %cst_11 = arith.constant 0.000000e+00 : f32
    %29 = vector.broadcast %cst_11 : f32 to vector<8x128xf32>
    %30 = arith.maximumf %28, %29 : vector<8x128xf32>
    %31 = arith.truncf %30 : vector<8x128xf32> to vector<8x128xbf16>
    %c0_12 = arith.constant 0 : index
    %c0_13 = arith.constant 0 : index
    %32 = vector.load %arg3[%c0_12, %c0_13] : memref<128x128xbf16, #tpu.memory_space<vmem>>, vector<128x128xbf16>
    %cst_14 = arith.constant dense<0.000000e+00> : vector<8x128xf32>
    %33 = tpu.matmul %31, %32, %cst_14 {dimension_numbers = #tpu.dot_dimension_numbers<[1], [0], [0], [1], [0, 0, 1, 1], [], []>} : vector<8x128xbf16>, vector<128x128xbf16>, vector<8x128xf32> -> vector<8x128xf32>
    %c0_15 = arith.constant 0 : index
    %c0_16 = arith.constant 0 : index
    %34 = vector.load %arg4[%c0_15, %c0_16] : memref<2x128xf32, #tpu.memory_space<vmem>>, vector<2x128xf32>
    %35 = vector.extract_strided_slice %34 {offsets = [0, 0], sizes = [1, 128], strides = [1, 1]} : vector<2x128xf32> to vector<1x128xf32>
    %36 = vector.extract_strided_slice %34 {offsets = [1, 0], sizes = [1, 128], strides = [1, 1]} : vector<2x128xf32> to vector<1x128xf32>
    %cst_17 = arith.constant dense<0.000000e+00> : vector<128xf32>
    %37 = vector.multi_reduction <add>, %33, %cst_17 [0] : vector<8x128xf32> to vector<128xf32>
    %38 = vector.shape_cast %37 : vector<128xf32> to vector<1x128xf32>
    %39 = arith.mulf %33, %33 : vector<8x128xf32>
    %cst_18 = arith.constant dense<0.000000e+00> : vector<128xf32>
    %40 = vector.multi_reduction <add>, %39, %cst_18 [0] : vector<8x128xf32> to vector<128xf32>
    %41 = vector.shape_cast %40 : vector<128xf32> to vector<1x128xf32>
    %cst_19 = arith.constant 1.250000e-01 : f32
    %42 = vector.broadcast %cst_19 : f32 to vector<1x128xf32>
    %43 = arith.mulf %38, %42 : vector<1x128xf32>
    %cst_20 = arith.constant 1.250000e-01 : f32
    %44 = vector.broadcast %cst_20 : f32 to vector<1x128xf32>
    %45 = arith.mulf %41, %44 : vector<1x128xf32>
    %46 = arith.mulf %43, %43 : vector<1x128xf32>
    %47 = arith.subf %45, %46 : vector<1x128xf32>
    %cst_21 = arith.constant 0.000000e+00 : f32
    %48 = vector.broadcast %cst_21 : f32 to vector<1x128xf32>
    %49 = arith.maximumf %47, %48 : vector<1x128xf32>
    %cst_22 = arith.constant 9.99999974E-6 : f32
    %50 = vector.broadcast %cst_22 : f32 to vector<1x128xf32>
    %51 = arith.addf %49, %50 : vector<1x128xf32>
    %52 = math.rsqrt %51 : vector<1x128xf32>
    %53 = arith.mulf %35, %52 : vector<1x128xf32>
    %54 = arith.mulf %43, %53 : vector<1x128xf32>
    %55 = arith.subf %36, %54 : vector<1x128xf32>
    %56 = vector.broadcast %53 : vector<1x128xf32> to vector<8x128xf32>
    %57 = arith.mulf %33, %56 : vector<8x128xf32>
    %58 = vector.broadcast %55 : vector<1x128xf32> to vector<8x128xf32>
    %59 = arith.addf %57, %58 : vector<8x128xf32>
    %cst_23 = arith.constant 0.000000e+00 : f32
    %60 = vector.broadcast %cst_23 : f32 to vector<8x128xf32>
    %61 = arith.maximumf %59, %60 : vector<8x128xf32>
    %62 = arith.truncf %61 : vector<8x128xf32> to vector<8x128xbf16>
    %c0_24 = arith.constant 0 : index
    %c0_25 = arith.constant 0 : index
    %63 = vector.load %arg5[%c0_24, %c0_25] : memref<128x128xbf16, #tpu.memory_space<vmem>>, vector<128x128xbf16>
    %cst_26 = arith.constant dense<0.000000e+00> : vector<8x128xf32>
    %64 = tpu.matmul %62, %63, %cst_26 {dimension_numbers = #tpu.dot_dimension_numbers<[1], [0], [0], [1], [0, 0, 1, 1], [], []>} : vector<8x128xbf16>, vector<128x128xbf16>, vector<8x128xf32> -> vector<8x128xf32>
    %c0_27 = arith.constant 0 : index
    %c0_28 = arith.constant 0 : index
    %65 = vector.load %arg6[%c0_27, %c0_28] : memref<1x128xf32, #tpu.memory_space<vmem>>, vector<1x128xf32>
    %66 = vector.broadcast %65 : vector<1x128xf32> to vector<8x128xf32>
    %67 = arith.addf %64, %66 : vector<8x128xf32>
    %cst_29 = arith.constant 5.000000e-01 : f32
    %68 = vector.broadcast %cst_29 : f32 to vector<8x128xf32>
    %69 = arith.mulf %68, %67 : vector<8x128xf32>
    %70 = math.tanh %69 : vector<8x128xf32>
    %cst_30 = arith.constant 1.000000e+00 : f32
    %71 = vector.broadcast %cst_30 : f32 to vector<8x128xf32>
    %72 = arith.addf %70, %71 : vector<8x128xf32>
    %cst_31 = arith.constant 5.000000e-01 : f32
    %73 = vector.broadcast %cst_31 : f32 to vector<8x128xf32>
    %74 = arith.mulf %73, %72 : vector<8x128xf32>
    %75 = arith.truncf %74 : vector<8x128xf32> to vector<8x128xbf16>
    %c0_32 = arith.constant 0 : index
    %c0_33 = arith.constant 0 : index
    %76 = vector.load %arg7[%c0_32, %c0_33] : memref<8x128xbf16, #tpu.memory_space<vmem>>, vector<8x128xbf16>
    tpu.vector_store %arg7[%c0_32, %c0_33], %75 {strides = array<i32>} : memref<8x128xbf16, #tpu.memory_space<vmem>>, vector<8x128xbf16>,
    return
  }
}

</mosaic_0001>

<bundles_post_ra>
// kernel: generator_forward.1
= control target key start
LH: loop header
LB: loop body
LE: loop exit
PB: predicated region body
PF: predicated region fallthrough
CT: control target
= control target key end

     0   :  { %12 = vsyncpa [#allocation3], 0  ;;  %s723_s0 = inlined_call_operand.vmem [shape: bf16[8,128], index: 0, kind: input, shape index: {}]   ;;  %s724_s1 = inlined_call_operand.hbm [shape: bf16[128,128], index: 1, kind: input, shape index: {}]   ;;  %s725_s2 = inlined_call_operand.vmem [shape: f32[2,128], index: 2, kind: input, shape index: {}]   ;;  %s726_s3 = inlined_call_operand.hbm [shape: bf16[128,128], index: 3, kind: input, shape index: {}]   ;;  %s727_s4 = inlined_call_operand.vmem [shape: f32[2,128], index: 4, kind: input, shape index: {}]   ;;  %s728_s5 = inlined_call_operand.hbm [shape: bf16[128,128], index: 5, kind: input, shape index: {}]   ;;  %s729_s6 = inlined_call_operand.vmem [shape: f32[1,128], index: 6, kind: input, shape index: {}]   ;;  %s730_s7 = inlined_call_operand.hbm [shape: bf16[8,128], index: 7, kind: output, shape index: {}]  }
   0x1   :  { %13 = vsyncpa [#allocation6], 0 }
   0x2   :  { %14 = vsyncpa [#allocation4], 0  ;;  %s36_s26 = sshll.u32 %s726_s3, 4  ;;  %s653_s27 = smov [#allocation5]   ;;  %s37_s26 = int_to_ptr.hbm [resolvable:$true] %s36_s26 }
   0x3   :  { %s38_s28 = sshll.u32 %s653_s27, 4  ;;  %s21_s8 = sshll.u32 %s724_s1, 4  ;;  %s39_s28 = int_to_ptr.vmem [resolvable:$true] %s38_s28  ;;  %s22_s8 = int_to_ptr.hbm [resolvable:$true] %s21_s8 }
   0x4   :  { %s654_s9 = smov 64   ;;  %s655_s10 = smov 4  }
   0x5   :  { %44 = dma.hbm_to_vmem [thread:$0]  %s37_s26, 1024, %s39_s28, [#allocation6], %s654_s9, %s654_s9, %s655_s10  }
   0x6   :  { %s656_s11 = smov [#allocation2]   ;;  %s51_s15 = sshll.u32 %s728_s5, 4  ;;  %s52_s15 = int_to_ptr.hbm [resolvable:$true] %s51_s15 }
   0x7   :  { %s23_s12 = sshll.u32 %s656_s11, 4  ;;  %s657_s3 = smov [#allocation7]   ;;  %s24_s12 = int_to_ptr.vmem [resolvable:$true] %s23_s12 }
   0x8   :  { %29 = dma.hbm_to_vmem [thread:$0]  %s22_s8, 1024, %s24_s12, [#allocation3], %s654_s9, %s654_s9, %s655_s10  }
   0x9   :  { %s53_s16 = sshll.u32 %s657_s3, 4  ;;  %s54_s16 = int_to_ptr.vmem [resolvable:$true] %s53_s16 }
   0xa   :  { %59 = dma.hbm_to_vmem [thread:$0]  %s52_s15, 1024, %s54_s16, [#allocation6], %s654_s9, %s654_s9, %s655_s10  }
   0xb   :  { %647 = dma.done.wait [#allocation3], 1024  }
   0xc   :  { %648 = vsyncadd [#allocation3], 4294966272 }
   0xd   :  { %649 = dma.done.wait [#allocation6], 2048  }
   0xe   :  { %650 = vsyncadd [#allocation6], 4294965248  ;;  %v521_v0 = vld [vmem:[#allocation2 + $0x38] sm:$0xff]  ;;  %v520_v1 = vld [vmem:[#allocation2 + $0x30] sm:$0xff]  ;;  %s407_s24 = sshll.u32 %s730_s7, 4  ;;  %s408_s24 = int_to_ptr.hbm [resolvable:$true] %s407_s24 }
   0xf   :  { %139 = vmatpush.bf16.msra.mxu0 %v521_v0  ;;  %v519_v2 = vld [vmem:[#allocation2 + $0x28] sm:$0xff]  ;;  %v518_v3 = vld [vmem:[#allocation2 + $0x20] sm:$0xff]  ;;  %v517_v4 = vld [vmem:[#allocation2 + $0x18] sm:$0xff] }
  0x10   :  { %v516_v5 = vld [vmem:[#allocation2 + $0x10] sm:$0xff]  ;;  %v515_v6 = vld [vmem:[#allocation2 + $0x8] sm:$0xff]  ;;  %v514_v7 = vld [vmem:[#allocation2] sm:$0xff] }
  0x11   :  { %v74_v8 = vld [vmem:[%s723_s0] sm:$0xf]  ;;  %v529_v9 = vld [vmem:[#allocation5 + $0x38] sm:$0xff]  ;;  %v528_v10 = vld [vmem:[#allocation5 + $0x30] sm:$0xff] }
  0x12   :  { %258 = vmatpush.bf16.msra.mxu1 %v529_v9  ;;  %v527_v11 = vld [vmem:[#allocation5 + $0x28] sm:$0xff]  ;;  %v526_v12 = vld [vmem:[#allocation5 + $0x20] sm:$0xff]  ;;  %v525_v13 = vld [vmem:[#allocation5 + $0x18] sm:$0xff] }
  0x13   :  { %140 = vmatpush.bf16.msra.mxu0 %v520_v1  ;;  %v524_v17 = vld [vmem:[#allocation5 + $0x10] sm:$0xff]  ;;  %v523_v22 = vld [vmem:[#allocation5 + $0x8] sm:$0xff]  ;;  %v522_v28 = vld [vmem:[#allocation5] sm:$0xff] }
  0x14   :  { %v152_v43 = vld [vmem:[%s725_s2] sm:$0x3]  ;;  %v537_v56 = vld [vmem:[#allocation7 + $0x38] sm:$0xff]  ;;  %v536_v57 = vld [vmem:[#allocation7 + $0x30] sm:$0xff] }
  0x15   :  { %381 = vmatpush.bf16.msra.mxu2 %v537_v56  ;;  %v535_v58 = vld [vmem:[#allocation7 + $0x28] sm:$0xff]  ;;  %v534_v59 = vld [vmem:[#allocation7 + $0x20] sm:$0xff]  ;;  %v533_v60 = vld [vmem:[#allocation7 + $0x18] sm:$0xff] }
  0x16   :  { %259 = vmatpush.bf16.msra.mxu1 %v528_v10  ;;  %v532_v0 = vld [vmem:[#allocation7 + $0x10] sm:$0xff] }
  0x17   :  { %141 = vmatpush.bf16.msra.mxu0 %v519_v2 }
  0x19   :  { %382 = vmatpush.bf16.msra.mxu2 %v536_v57 }
  0x1a   :  { %260 = vmatpush.bf16.msra.mxu1 %v527_v11  ;;  %v530_v11 = vld [vmem:[#allocation7] sm:$0xff] }
  0x1b   :  { %142 = vmatpush.bf16.msra.mxu0 %v518_v3 }
  0x1d   :  { %383 = vmatpush.bf16.msra.mxu2 %v535_v58 }
  0x1e   :  { %261 = vmatpush.bf16.msra.mxu1 %v526_v12 }
  0x1f   :  { %143 = vmatpush.bf16.msra.mxu0 %v517_v4 }
  0x21   :  { %384 = vmatpush.bf16.msra.mxu2 %v534_v59 }
  0x22   :  { %262 = vmatpush.bf16.msra.mxu1 %v525_v13 }
  0x23   :  { %144 = vmatpush.bf16.msra.mxu0 %v516_v5  ;;  %v531_v5 = vld [vmem:[#allocation7 + $0x8] sm:$0xff] }
  0x25   :  { %385 = vmatpush.bf16.msra.mxu2 %v533_v60 }
  0x26   :  { %263 = vmatpush.bf16.msra.mxu1 %v524_v17 }
  0x27   :  { %145 = vmatpush.bf16.msra.mxu0 %v515_v6 }
  0x29   :  { %386 = vmatpush.bf16.msra.mxu2 %v532_v0 }
  0x2a   :  { %264 = vmatpush.bf16.msra.mxu1 %v523_v22 }
  0x2b   :  { %146 = vmatpush.bf16.msra.mxu0 %v514_v7 }
  0x2d   :  { %387 = vmatpush.bf16.msra.mxu2 %v531_v5 }
  0x2e   :  { %147 = vmatmul.bf16.vlgmr.msra.gmra.mxu0 %v74_v8  ;;  %265 = vmatpush.bf16.msra.mxu1 %v522_v28 }
  0x31   :  { %388 = vmatpush.bf16.msra.mxu2 %v530_v11 }
  0xab   :  { %v148_v14 = vpop.f32.mrf.mxu0 }
  0xac   :  { %v153_v15 = vrot.slane %v148_v14, 4  ;;  %v159_v16 = vmul.f32 %v148_v14, %v148_v14 }
  0xae   :  { %v154_v18 = vadd.f32 %v153_v15, %v148_v14  ;;  %v160_v19 = vrot.slane %v159_v16, 4 }
  0xb0   :  { %v155_v20 = vrot.slane %v154_v18, 2  ;;  %v161_v21 = vadd.f32 %v160_v19, %v159_v16 }
  0xb2   :  { %v156_v23 = vadd.f32 %v155_v20, %v154_v18  ;;  %v162_v24 = vrot.slane %v161_v21, 2 }
  0xb3   :  { %v150_v25 = vpop.f32.mrf.mxu0 }
  0xb4   :  { %v157_v26 = vrot.slane %v156_v23, 1  ;;  %v163_v27 = vadd.f32 %v162_v24, %v161_v21 }
  0xb6   :  { %v158_v29 = vadd.f32 %v157_v26, %v156_v23  ;;  %v164_v30 = vrot.slane %v163_v27, 1  ;;  %v271_v26 = vld [vmem:[%s727_s4] sm:$0x3]  ;;  %s658_s4 = smov [#allocation8]  }
  0xb7   :  { %s405_s21 = sshll.u32 %s658_s4, 4  ;;  %s406_s21 = int_to_ptr.vmem [resolvable:$true] %s405_s21 }
  0xb8   :  { %v165_v31 = vadd.f32 %v164_v30, %v163_v27  ;;  %v166_v32 = vmul.f32 0.125, %v158_v29 }
  0xba   :  { %v167_v33 = vmul.f32 0.125, %v165_v31  ;;  %v168_v34 = vmul.f32 %v166_v32, %v166_v32 }
  0xbc   :  { %v169_v35 = vsub.f32 %v167_v33, %v168_v34 }
  0xbe   :  { %v170_v36 = vmax.f32 %v169_v35, 0.0 }
  0xc0   :  { %v171_v37 = vadd.f32 1e-05, %v170_v36 }
  0xc2   :  { %545 = vrsqrt.f32 %v171_v37  ;;  %vm178_vm1 = vweird.f32 %v171_v37 }
  0xc8   :  { %v546_v38 = vpop.eup %545 }
  0xc9   :  { %v173_v39 = vmul.f32 %v546_v38, %v171_v37  ;;  %vm179_vm0 = vweird.f32 %v546_v38 }
  0xca   :  { %vm180_vm2 = vmor %vm178_vm1, %vm179_vm0 }
  0xcb   :  { %v174_v40 = vmul.f32 %v546_v38, %v173_v39  ;;  %v544_v39 = vld [vmem:[%s729_s6] ss:$0 sm:$0xff] }
  0xcd   :  { %v175_v41 = vmul.f32 0.5, %v174_v40 }
  0xcf   :  { %v176_v42 = vsub.f32 1.5, %v175_v41 }
  0xd1   :  { %v177_v44 = vmul.f32 %v546_v38, %v176_v42 }
  0xd3   :  { %v181_v45 = vsel %vm180_vm2, %v546_v38, %v177_v44 }
  0xd4   :  { %v182_v46 = vmul.f32 %v181_v45, %v152_v43 }
  0xd6   :  { %v183_v47 = vmul.f32 %v182_v46, %v166_v32  ;;  %v188_v49 = vperm.slane %v182_v46, 0 }
  0xd8   :  { %v185_v48 = vrot.slane %v183_v47, 7  ;;  %v189_v51 = vmul.f32 %v188_v49, %v148_v14 }
  0xda   :  { %v187_v50 = vsub.f32 %v152_v43, %v185_v48 }
  0xdc   :  { %v190_v52 = vperm.slane %v187_v50, 1 }
  0xde   :  { %v191_v53 = vadd.f32 %v190_v52, %v189_v51 }
  0xe0   :  { %v192_v54 = vmax.f32 %v191_v53, 0.0 }
  0xe2   :  { %v193_v55 = vpack.c.bf16 %v192_v54, %v192_v54 }
  0xe4   :  { %266 = vmatmul.bf16.vlgmr.msra.gmra.mxu1 %v193_v55 }
 0x161   :  { %v267_v61 = vpop.f32.mrf.mxu1 }
 0x162   :  { %v272_v62 = vrot.slane %v267_v61, 4  ;;  %v278_v63 = vmul.f32 %v267_v61, %v267_v61 }
 0x164   :  { %v273_v1 = vadd.f32 %v272_v62, %v267_v61  ;;  %v279_v2 = vrot.slane %v278_v63, 4 }
 0x166   :  { %v274_v3 = vrot.slane %v273_v1, 2  ;;  %v280_v4 = vadd.f32 %v279_v2, %v278_v63 }
 0x168   :  { %v275_v6 = vadd.f32 %v274_v3, %v273_v1  ;;  %v281_v7 = vrot.slane %v280_v4, 2 }
 0x169   :  { %v269_v8 = vpop.f32.mrf.mxu1 }
 0x16a   :  { %v276_v9 = vrot.slane %v275_v6, 1  ;;  %v282_v10 = vadd.f32 %v281_v7, %v280_v4 }
 0x16c   :  { %v277_v12 = vadd.f32 %v276_v9, %v275_v6  ;;  %v283_v13 = vrot.slane %v282_v10, 1 }
 0x16e   :  { %v284_v14 = vadd.f32 %v283_v13, %v282_v10  ;;  %v285_v15 = vmul.f32 0.125, %v277_v12 }
 0x170   :  { %v286_v16 = vmul.f32 0.125, %v284_v14  ;;  %v287_v17 = vmul.f32 %v285_v15, %v285_v15 }
 0x172   :  { %v288_v18 = vsub.f32 %v286_v16, %v287_v17 }
 0x174   :  { %v289_v19 = vmax.f32 %v288_v18, 0.0 }
 0x176   :  { %v290_v20 = vadd.f32 1e-05, %v289_v19 }
 0x178   :  { %547 = vrsqrt.f32 %v290_v20  ;;  %vm297_vm4 = vweird.f32 %v290_v20 }
 0x17e   :  { %v548_v21 = vpop.eup %547 }
 0x17f   :  { %v292_v22 = vmul.f32 %v548_v21, %v290_v20  ;;  %vm298_vm3 = vweird.f32 %v548_v21 }
 0x180   :  { %vm299_vm5 = vmor %vm297_vm4, %vm298_vm3 }
 0x181   :  { %v293_v23 = vmul.f32 %v548_v21, %v292_v22 }
 0x183   :  { %v294_v24 = vmul.f32 0.5, %v293_v23 }
 0x185   :  { %v295_v25 = vsub.f32 1.5, %v294_v24 }
 0x187   :  { %v296_v27 = vmul.f32 %v548_v21, %v295_v25 }
 0x189   :  { %v300_v28 = vsel %vm299_vm5, %v548_v21, %v296_v27 }
 0x18a   :  { %v301_v29 = vmul.f32 %v300_v28, %v271_v26 }
 0x18c   :  { %v302_v30 = vmul.f32 %v301_v29, %v285_v15  ;;  %v307_v32 = vperm.slane %v301_v29, 0 }
 0x18e   :  { %v304_v31 = vrot.slane %v302_v30, 7  ;;  %v308_v34 = vmul.f32 %v307_v32, %v267_v61 }
 0x190   :  { %v306_v33 = vsub.f32 %v271_v26, %v304_v31 }
 0x192   :  { %v309_v35 = vperm.slane %v306_v33, 1 }
 0x194   :  { %v310_v36 = vadd.f32 %v309_v35, %v308_v34 }
 0x196   :  { %v311_v37 = vmax.f32 %v310_v36, 0.0 }
 0x198   :  { %v312_v38 = vpack.c.bf16 %v311_v37, %v311_v37 }
 0x19a   :  { %389 = vmatmul.bf16.vlgmr.msra.gmra.mxu2 %v312_v38 }
 0x21d   :  { %v390_v40 = vpop.f32.mrf.mxu2 }
 0x21e   :  { %v391_v41 = vadd.f32 %v544_v39, %v390_v40 }
 0x220   :  { %v394_v42 = vmul.f32 0.5, %v391_v41 }
 0x222   :  { %549 = vtanh.f32 %v394_v42 }
 0x225   :  { %v392_v43 = vpop.f32.mrf.mxu2 }
 0x228   :  { %v550_v44 = vpop.eup %549 }
 0x229   :  { %v396_v45 = vadd.f32 1.0, %v550_v44 }
 0x22b   :  { %v397_v46 = vmul.f32 0.5, %v396_v45 }
 0x22d   :  { %v398_v47 = vpack.c.bf16 %v397_v46, %v397_v46 }
 0x22f   :  { %399 = vst [vmem:[#allocation8] sm:$0xf] %v398_v47 }
 0x230   :  { %410 = dma.vmem_to_hbm [thread:$0]  %s406_s21, 64, %s408_s24, [#allocation4]  }
 0x231   :  { %651 = dma.done.wait [#allocation4], 64  }
 0x232   :  { %652 = vsyncadd [#allocation4], 4294967232 }
 0x233   :  { %415 = vsyncpa [#allocation3], 1 }
 0x234   :  { %416 = vsyncpa [#allocation6], 1 }
 0x235   :  { %417 = vsyncpa [#allocation4], 1 }

</bundles_post_ra>
